<compile_context>
chip_gen: v7x
topology: tpu7x:2x2x1
jax: 0.10.0
libtpu: 0.0.40
codegen_flags: <defaults>
</compile_context>

<pallas_src>
import functools

import jax
import jax.numpy as jnp
from jax import lax
from jax.experimental import pallas as pl
from jax.experimental.pallas import tpu as pltpu

_LANE = 128


def _round_down_to(x: int, m: int) -> int:
    return (x // m) * m


def _vmem_capacity_bytes() -> int:
    """Physical VMEM of the local TPU; conservative fallback = v7x (64 MiB)."""
    try:
        return int(pltpu.get_tpu_info().vmem_capacity_bytes)
    except Exception:
        return 64 << 20


def _pick_hw_tile(hw: int, c: int, feat_dim: int, x_itemsize: int) -> int:
    """Spatial tile sized by BYTES, not lane count.

    Per-lane VMEM cost:
      * 2 x (double-buffered) streamed x columns:        2 * c * x_itemsize
      * f32 backbone activations + elementwise temps:    ~4 * feat_dim * 4
    Budget: half of physical VMEM, capped at 40 MiB (safe on v7x's 64 MiB
    physical; v5e/v6e have 128 MiB).  The resulting tile is a multiple of 128
    lanes, or the full HW extent when HW already fits.
    """
    vmem_cap = _vmem_capacity_bytes()
    budget = min(vmem_cap // 2, 40 << 20)
    bytes_per_lane = 2 * c * x_itemsize + 4 * feat_dim * 4
    t = max(_LANE, _round_down_to(budget // bytes_per_lane, _LANE))
    if t >= hw:
        return hw            # full extent: always a legal block shape
    return t


def signal_encoder_kernel(
    x_ref,      # (C, T)    bf16  current spatial tile of one batch element
    wbb_ref,    # (F, C)    bf16  synthetic 1x1-conv weight
    bbb_ref,    # (F, 1)    f32
    w1t_ref,    # (F, 128)  f32   fc1 weight pre-transposed to (in, out)
    b1_ref,     # (1, 128)  f32
    w2t_ref,    # (128, 64) f32
    b2_ref,     # (1, 64)   f32
    w3t_ref,    # (64, NC)  f32
    b3_ref,     # (1, NC)   f32
    feat_ref,   # (1, F)    normalized features (lane-dense row)
    pred_ref,   # (1, NC)   classifier logits (lane-dense row)
    acc_ref,    # (F, 1)    f32 GAP accumulator scratch (persists across tiles)
    *,
    hw_total: int,
    hw_tile: int,
    needs_mask: bool,
    inv_hw: float,
):
    j = pl.program_id(1)

    @pl.when(j == 0)
    def _init():
        acc_ref[...] = jnp.zeros_like(acc_ref)

    # --- backbone: 1x1 conv (per-pixel matmul) + ReLU, HW on the lane axis ---
    h = jnp.dot(wbb_ref[...], x_ref[...], preferred_element_type=jnp.float32)
    h = jnp.maximum(h + bbb_ref[...], 0.0)                        # (F, T) f32

    if needs_mask:
        # cdiv grid: last tile may read past HW -> padded columns hold garbage
        # and ReLU(garbage*w + b) != 0, so zero them BEFORE the GAP sum.
        valid = hw_total - j * hw_tile                             # traced i32
        col = lax.broadcasted_iota(jnp.int32, (1, h.shape[1]), 1)  # (1, T)
        h = jnp.where(col < valid, h, 0.0)

    # partial global-average-pool: one vectorised lane reduction per tile (XLU)
    acc_ref[...] += jnp.sum(h, axis=-1, keepdims=True)             # (F, 1)

    # --- finalize on the last spatial tile: L2-normalize + classifier MLP ----
    @pl.when(j == pl.num_programs(1) - 1)
    def _finalize():
        f_dim = acc_ref.shape[0]
        feat_col = acc_ref[...] * inv_hw                           # (F, 1) GAP
        # F.normalize: v / max(||v||, 1e-12) == v * rsqrt(max(sumsq, 1e-24))
        sumsq = jnp.sum(feat_col * feat_col, axis=0, keepdims=True)   # (1, 1)
        inv_norm = lax.rsqrt(jnp.maximum(sumsq, 1e-24))
        normed_col = feat_col * inv_norm                           # (F, 1)

        # tiny once-per-batch "transpose" to a lane-dense (1, F) row:
        # diagonal select + sublane reduction (no explicit relayout op).
        rows = lax.broadcasted_iota(jnp.int32, (f_dim, f_dim), 0)
        cols = lax.broadcasted_iota(jnp.int32, (f_dim, f_dim), 1)
        feat_row = jnp.sum(jnp.where(rows == cols, normed_col, 0.0),
                           axis=0, keepdims=True)                  # (1, F)
        feat_ref[...] = feat_row

        # Classifier: fc1 -> ReLU -> [dropout=id] -> fc2 -> ReLU -> fc3
        # TODO(synk): nn.Dropout(p=0.25) treated as identity (inference).
        h1 = jnp.dot(feat_row, w1t_ref[...], preferred_element_type=jnp.float32)
        h1 = jnp.maximum(h1 + b1_ref[...], 0.0)                    # (1, 128)
        h2 = jnp.dot(h1, w2t_ref[...], preferred_element_type=jnp.float32)
        h2 = jnp.maximum(h2 + b2_ref[...], 0.0)                    # (1, 64)
        pred_ref[...] = (
            jnp.dot(h2, w3t_ref[...], preferred_element_type=jnp.float32)
            + b3_ref[...]
        )


def _const_spec(shape):
    """BlockSpec for an operand whose block index never changes.

    Single-buffered (pl.Buffered(1)) when the installed Pallas exposes
    pipeline_mode; gracefully falls back to the default double-buffering.
    """
    idx = lambda i, j, _n=len(shape): (0,) * _n
    try:
        return pl.BlockSpec(shape, idx, pipeline_mode=pl.Buffered(1))
    except Exception:
        return pl.BlockSpec(shape, idx)


def signal_encoder_forward(x_nchw, params, *, compute_dtype=jnp.bfloat16,
                           hw_tile=None):
    N, C, H, W = x_nchw.shape
    HW = H * W
    F_dim = params["w_bb"].shape[0]
    num_classes = params["w3"].shape[0]

    x_itemsize = jnp.dtype(compute_dtype).itemsize
    T = hw_tile if hw_tile is not None else _pick_hw_tile(HW, C, F_dim, x_itemsize)
    T = min(T, HW)
    if T < HW:
        assert T % _LANE == 0, "spatial tile must be a multiple of 128 lanes"
    n_hw_tiles = (HW + T - 1) // T
    needs_mask = (HW % T) != 0

    # NCHW -> (N, C, HW): contiguous reshape.  Stream x (and the tiny 1x1-conv
    # weight) in bf16: halves the dominant HBM traffic; accumulate in f32.
    x_nc_hw = x_nchw.reshape(N, C, HW).astype(compute_dtype)
    w_bb = params["w_bb"].astype(compute_dtype)                    # (F, C)
    b_bb = params["b_bb"].reshape(F_dim, 1).astype(jnp.float32)    # (F, 1)
    # Classifier weights pre-transposed to (in, out), biases as rows, so the
    # per-batch finalize/MLP is lane-dense (host-side layout plumbing only).
    w1t = params["w1"].T.astype(jnp.float32)                       # (F, 128)
    b1 = params["b1"].reshape(1, -1).astype(jnp.float32)           # (1, 128)
    w2t = params["w2"].T.astype(jnp.float32)                       # (128, 64)
    b2 = params["b2"].reshape(1, -1).astype(jnp.float32)           # (1, 64)
    w3t = params["w3"].T.astype(jnp.float32)                       # (64, NC)
    b3 = params["b3"].reshape(1, -1).astype(jnp.float32)           # (1, NC)

    # Explicit per-generation scoped-VMEM limit: double-buffered x tile + f32
    # backbone activations/temps + headroom, never above physical capacity.
    tile_x_bytes = C * T * x_itemsize
    interm_bytes = 4 * F_dim * T * 4
    vmem_cap = _vmem_capacity_bytes()
    vmem_limit = min(vmem_cap - (8 << 20),
                     2 * tile_x_bytes + interm_bytes + (8 << 20))
    vmem_limit = max(int(vmem_limit), 16 << 20)

    grid_spec = pltpu.PrefetchScalarGridSpec(
        num_scalar_prefetch=0,
        grid=(N, n_hw_tiles),
        in_specs=[
            pl.BlockSpec((None, C, T), lambda i, j: (i, 0, j)),
            _const_spec((F_dim, C)),
            _const_spec((F_dim, 1)),
            _const_spec((F_dim, 128)),
            _const_spec((1, 128)),
            _const_spec((128, 64)),
            _const_spec((1, 64)),
            _const_spec((64, num_classes)),
            _const_spec((1, num_classes)),
        ],
        out_specs=(
            pl.BlockSpec((None, 1, F_dim), lambda i, j: (i, 0, 0)),
            pl.BlockSpec((None, 1, num_classes), lambda i, j: (i, 0, 0)),
        ),
        scratch_shapes=[pltpu.VMEM((F_dim, 1), jnp.float32)],
    )

    feat3d, pred3d = pl.pallas_call(
        functools.partial(signal_encoder_kernel,
                          hw_total=HW, hw_tile=T, needs_mask=needs_mask,
                          inv_hw=1.0 / HW),
        out_shape=(jax.ShapeDtypeStruct((N, 1, F_dim), jnp.float32),
                   jax.ShapeDtypeStruct((N, 1, num_classes), jnp.float32)),
        grid_spec=grid_spec,
        compiler_params=pltpu.CompilerParams(
            dimension_semantics=("parallel", "arbitrary"),
            vmem_limit_bytes=vmem_limit),
    )(x_nc_hw, w_bb, b_bb, w1t, b1, w2t, b2, w3t, b3)

    out_features = feat3d.reshape(N, F_dim)
    predictions = pred3d.reshape(N, num_classes)
    # matches: return (tuple([out_features]), tuple([predictions]))
    return (out_features,), (predictions,)


def init_params(key, in_channels, feat_dim, num_classes):
    ks = jax.random.split(key, 8)
    s = 0.1
    return {
        # synthetic backbone 1x1 conv: weight (out=F, in=C), bias (F,)
        "w_bb": s * jax.random.normal(ks[0], (feat_dim, in_channels), jnp.float32),
        "b_bb": s * jax.random.normal(ks[1], (feat_dim,), jnp.float32),
        # Classifier Linear layers in native PyTorch (out, in) layout
        "w1": s * jax.random.normal(ks[2], (128, feat_dim), jnp.float32),
        "b1": s * jax.random.normal(ks[3], (128,), jnp.float32),
        "w2": s * jax.random.normal(ks[4], (64, 128), jnp.float32),
        "b2": s * jax.random.normal(ks[5], (64,), jnp.float32),
        "w3": s * jax.random.normal(ks[6], (num_classes, 64), jnp.float32),
        "b3": jnp.zeros((num_classes,), jnp.float32),
    }


def reference_forward(x_nchw, p):
    """Pure-JAX f32 reference for correctness checking."""
    N, C, H, W = x_nchw.shape
    x2 = x_nchw.reshape(N, C, H * W)
    h = jnp.maximum(
        jnp.einsum("fc,nct->nft", p["w_bb"], x2) + p["b_bb"][None, :, None], 0.0)
    feat = jnp.mean(h, axis=-1)                                    # (N, F)
    nrm = jnp.sqrt(jnp.sum(feat * feat, axis=-1, keepdims=True))
    normed = feat / jnp.maximum(nrm, 1e-12)
    h1 = jnp.maximum(normed @ p["w1"].T + p["b1"], 0.0)
    h2 = jnp.maximum(h1 @ p["w2"].T + p["b2"], 0.0)
    pred = h2 @ p["w3"].T + p["b3"]
    return normed, pred


if __name__ == "__main__":
    key = jax.random.PRNGKey(0)
    k_x, k_x2, k_p = jax.random.split(key, 3)

    N, C, FEAT_DIM, NUM_CLASSES = 2, 4, 32, 10
    params = init_params(k_p, C, FEAT_DIM, NUM_CLASSES)

    # --- run 1: default byte-sized tile (single tile at this small HW) -------
    x = jax.random.normal(k_x, (N, C, 16, 16), jnp.float32)
    (out_features,), (predictions,) = signal_encoder_forward(x, params)
    jax.block_until_ready(out_features)
    jax.block_until_ready(predictions)

    assert out_features.shape == (N, FEAT_DIM)
    assert predictions.shape == (N, NUM_CLASSES)

    # normalized features should have unit L2 norm per row (done in f32)
    norms = jnp.sqrt(jnp.sum(out_features * out_features, axis=-1))
    assert jnp.allclose(norms, jnp.ones((N,)), atol=1e-5)

    # bf16-streamed x vs f32 reference -> looser tolerance (f32 accumulation)
    ref_feat, ref_pred = reference_forward(x, params)
    assert jnp.allclose(out_features, ref_feat, atol=2e-2, rtol=2e-2)
    assert jnp.allclose(predictions, ref_pred, atol=2e-2, rtol=2e-2)

    # --- run 2: forced small tile + non-divisible HW -> cdiv grid + masking --
    x2 = jax.random.normal(k_x2, (N, C, 20, 20), jnp.float32)      # HW = 400
    (f2,), (p2,) = signal_encoder_forward(x2, params, hw_tile=128)
    jax.block_until_ready(f2)
    jax.block_until_ready(p2)
    rf2, rp2 = reference_forward(x2, params)
    assert jnp.allclose(f2, rf2, atol=2e-2, rtol=2e-2)
    assert jnp.allclose(p2, rp2, atol=2e-2, rtol=2e-2)

    print("KERNEL_OK")
</pallas_src>

<mosaic_0001>
module attributes {stable_mosaic.version = 11 : i64} {
  func.func @signal_encoder_kernel(%arg0: i32, %arg1: i32, %arg2: memref<1x4x256xbf16, #tpu.memory_space<vmem>>, %arg3: memref<32x4xbf16, #tpu.memory_space<vmem>>, %arg4: memref<32x1xf32, #tpu.memory_space<vmem>>, %arg5: memref<32x128xf32, #tpu.memory_space<vmem>>, %arg6: memref<1x128xf32, #tpu.memory_space<vmem>>, %arg7: memref<128x64xf32, #tpu.memory_space<vmem>>, %arg8: memref<1x64xf32, #tpu.memory_space<vmem>>, %arg9: memref<64x10xf32, #tpu.memory_space<vmem>>, %arg10: memref<1x10xf32, #tpu.memory_space<vmem>>, %arg11: memref<1x1x32xf32, #tpu.memory_space<vmem>>, %arg12: memref<1x1x10xf32, #tpu.memory_space<vmem>>, %arg13: memref<32x1xf32, #tpu.memory_space<vmem>>) attributes {dimension_semantics = [#tpu.dimension_semantics<parallel>, #tpu.dimension_semantics<arbitrary>], iteration_bounds = array<i64: 2, 1>, scalar_prefetch = 0 : i64, scratch_operands = 1 : i64, tpu.core_type = #tpu.core_type<tc>, window_params = [{transform_indices = @transform_0, window_bounds = array<i64: 1, 4, 256>}, {pipeline_mode = #tpu.pipeline_mode<synchronous>, transform_indices = @transform_1, window_bounds = array<i64: 32, 4>}, {pipeline_mode = #tpu.pipeline_mode<synchronous>, transform_indices = @transform_2, window_bounds = array<i64: 32, 1>}, {pipeline_mode = #tpu.pipeline_mode<synchronous>, transform_indices = @transform_3, window_bounds = array<i64: 32, 128>}, {pipeline_mode = #tpu.pipeline_mode<synchronous>, transform_indices = @transform_4, window_bounds = array<i64: 1, 128>}, {pipeline_mode = #tpu.pipeline_mode<synchronous>, transform_indices = @transform_5, window_bounds = array<i64: 128, 64>}, {pipeline_mode = #tpu.pipeline_mode<synchronous>, transform_indices = @transform_6, window_bounds = array<i64: 1, 64>}, {pipeline_mode = #tpu.pipeline_mode<synchronous>, transform_indices = @transform_7, window_bounds = array<i64: 64, 10>}, {pipeline_mode = #tpu.pipeline_mode<synchronous>, transform_indices = @transform_8, window_bounds = array<i64: 1, 10>}, {transform_indices = @transform_9, window_bounds = array<i64: 1, 1, 32>}, {transform_indices = @transform_10, window_bounds = array<i64: 1, 1, 10>}]} {
    %c0_i32 = arith.constant 0 : i32
    %0 = arith.cmpi eq, %arg1, %c0_i32 : i32
    %1 = arith.extui %0 : i1 to i32
    %c0_i32_0 = arith.constant 0 : i32
    %2 = arith.cmpi ne, %1, %c0_i32_0 : i32
    scf.if %2 {
      %cst_15 = arith.constant 0.000000e+00 : f32
      %20 = vector.broadcast %cst_15 : f32 to vector<32x1xf32>
      %c0_16 = arith.constant 0 : index
      %c0_17 = arith.constant 0 : index
      %21 = vector.load %arg13[%c0_16, %c0_17] : memref<32x1xf32, #tpu.memory_space<vmem>>, vector<32x1xf32>
      tpu.vector_store %arg13[%c0_16, %c0_17], %20 {strides = array<i32>} : memref<32x1xf32, #tpu.memory_space<vmem>>, vector<32x1xf32>,
    } else {
    }
    %c0 = arith.constant 0 : index
    %c0_1 = arith.constant 0 : index
    %3 = vector.load %arg3[%c0, %c0_1] : memref<32x4xbf16, #tpu.memory_space<vmem>>, vector<32x4xbf16>
    %c0_2 = arith.constant 0 : index
    %c0_3 = arith.constant 0 : index
    %c0_4 = arith.constant 0 : index
    %4 = vector.load %arg2[%c0_2, %c0_3, %c0_4] : memref<1x4x256xbf16, #tpu.memory_space<vmem>>, vector<1x4x256xbf16>
    %5 = vector.shape_cast %4 : vector<1x4x256xbf16> to vector<4x256xbf16>
    %cst = arith.constant dense<0.000000e+00> : vector<32x256xf32>
    %6 = tpu.matmul %3, %5, %cst {dimension_numbers = #tpu.dot_dimension_numbers<[1], [0], [0], [1], [0, 0, 1, 1], [], []>} : vector<32x4xbf16>, vector<4x256xbf16>, vector<32x256xf32> -> vector<32x256xf32>
    %c0_5 = arith.constant 0 : index
    %c0_6 = arith.constant 0 : index
    %7 = vector.load %arg4[%c0_5, %c0_6] : memref<32x1xf32, #tpu.memory_space<vmem>>, vector<32x1xf32>
    %8 = vector.broadcast %7 : vector<32x1xf32> to vector<32x256xf32>
    %9 = arith.addf %6, %8 : vector<32x256xf32>
    %cst_7 = arith.constant 0.000000e+00 : f32
    %10 = vector.broadcast %cst_7 : f32 to vector<32x256xf32>
    %11 = arith.maximumf %9, %10 : vector<32x256xf32>
    %c0_8 = arith.constant 0 : index
    %c0_9 = arith.constant 0 : index
    %12 = vector.load %arg13[%c0_8, %c0_9] : memref<32x1xf32, #tpu.memory_space<vmem>>, vector<32x1xf32>
    %cst_10 = arith.constant dense<0.000000e+00> : vector<32xf32>
    %13 = vector.multi_reduction <add>, %11, %cst_10 [1] : vector<32x256xf32> to vector<32xf32>
    %14 = vector.shape_cast %13 : vector<32xf32> to vector<32x1xf32>
    %15 = arith.addf %12, %14 : vector<32x1xf32>
    %c0_11 = arith.constant 0 : index
    %c0_12 = arith.constant 0 : index
    %16 = vector.load %arg13[%c0_11, %c0_12] : memref<32x1xf32, #tpu.memory_space<vmem>>, vector<32x1xf32>
    tpu.vector_store %arg13[%c0_11, %c0_12], %15 {strides = array<i32>} : memref<32x1xf32, #tpu.memory_space<vmem>>, vector<32x1xf32>,
    %c0_i32_13 = arith.constant 0 : i32
    %17 = arith.cmpi eq, %arg1, %c0_i32_13 : i32
    %18 = arith.extui %17 : i1 to i32
    %c0_i32_14 = arith.constant 0 : i32
    %19 = arith.cmpi ne, %18, %c0_i32_14 : i32
    scf.if %19 {
      %c0_15 = arith.constant 0 : index
      %c0_16 = arith.constant 0 : index
      %20 = vector.load %arg13[%c0_15, %c0_16] : memref<32x1xf32, #tpu.memory_space<vmem>>, vector<32x1xf32>
      %cst_17 = arith.constant 3.906250e-03 : f32
      %21 = vector.broadcast %cst_17 : f32 to vector<32x1xf32>
      %22 = arith.mulf %20, %21 : vector<32x1xf32>
      %23 = arith.mulf %22, %22 : vector<32x1xf32>
      %cst_18 = arith.constant dense<0.000000e+00> : vector<1xf32>
      %24 = vector.multi_reduction <add>, %23, %cst_18 [0] : vector<32x1xf32> to vector<1xf32>
      %25 = vector.shape_cast %24 : vector<1xf32> to vector<1x1xf32>
      %cst_19 = arith.constant 1.000000e-24 : f32
      %26 = vector.broadcast %cst_19 : f32 to vector<1x1xf32>
      %27 = arith.maximumf %25, %26 : vector<1x1xf32>
      %28 = math.rsqrt %27 : vector<1x1xf32>
      %29 = vector.broadcast %28 : vector<1x1xf32> to vector<32x1xf32>
      %30 = arith.mulf %22, %29 : vector<32x1xf32>
      %31 = tpu.iota {dimensions = array<i32: 0>} : vector<32x32xi32>
      %32 = tpu.iota {dimensions = array<i32: 1>} : vector<32x32xi32>
      %33 = arith.cmpi eq, %31, %32 : vector<32x32xi32>
      %cst_20 = arith.constant 0.000000e+00 : f32
      %34 = vector.shape_cast %30 : vector<32x1xf32> to vector<32x1xf32>
      %35 = vector.broadcast %34 : vector<32x1xf32> to vector<32x32xf32>
      %36 = vector.broadcast %cst_20 : f32 to vector<32x32xf32>
      %37 = arith.select %33, %35, %36 : vector<32x32xi1>, vector<32x32xf32>
      %cst_21 = arith.constant dense<0.000000e+00> : vector<32xf32>
      %38 = vector.multi_reduction <add>, %37, %cst_21 [0] : vector<32x32xf32> to vector<32xf32>
      %39 = vector.shape_cast %38 : vector<32xf32> to vector<1x32xf32>
      %c0_22 = arith.constant 0 : index
      %c0_23 = arith.constant 0 : index
      %c0_24 = arith.constant 0 : index
      %40 = vector.load %arg11[%c0_22, %c0_23, %c0_24] : memref<1x1x32xf32, #tpu.memory_space<vmem>>, vector<1x1x32xf32>
      %41 = vector.shape_cast %40 : vector<1x1x32xf32> to vector<1x32xf32>
      %42 = vector.shape_cast %39 : vector<1x32xf32> to vector<1x1x32xf32>
      tpu.vector_store %arg11[%c0_22, %c0_23, %c0_24], %42 {strides = array<i32>} : memref<1x1x32xf32, #tpu.memory_space<vmem>>, vector<1x1x32xf32>,
      %c0_25 = arith.constant 0 : index
      %c0_26 = arith.constant 0 : index
      %43 = vector.load %arg5[%c0_25, %c0_26] : memref<32x128xf32, #tpu.memory_space<vmem>>, vector<32x128xf32>
      %cst_27 = arith.constant dense<0.000000e+00> : vector<1x128xf32>
      %44 = tpu.matmul %39, %43, %cst_27 {dimension_numbers = #tpu.dot_dimension_numbers<[1], [0], [0], [1], [0, 0, 1, 1], [], []>} : vector<1x32xf32>, vector<32x128xf32>, vector<1x128xf32> -> vector<1x128xf32>
      %c0_28 = arith.constant 0 : index
      %c0_29 = arith.constant 0 : index
      %45 = vector.load %arg6[%c0_28, %c0_29] : memref<1x128xf32, #tpu.memory_space<vmem>>, vector<1x128xf32>
      %46 = arith.addf %44, %45 : vector<1x128xf32>
      %cst_30 = arith.constant 0.000000e+00 : f32
      %47 = vector.broadcast %cst_30 : f32 to vector<1x128xf32>
      %48 = arith.maximumf %46, %47 : vector<1x128xf32>
      %c0_31 = arith.constant 0 : index
      %c0_32 = arith.constant 0 : index
      %49 = vector.load %arg7[%c0_31, %c0_32] : memref<128x64xf32, #tpu.memory_space<vmem>>, vector<128x64xf32>
      %cst_33 = arith.constant dense<0.000000e+00> : vector<1x64xf32>
      %50 = tpu.matmul %48, %49, %cst_33 {dimension_numbers = #tpu.dot_dimension_numbers<[1], [0], [0], [1], [0, 0, 1, 1], [], []>} : vector<1x128xf32>, vector<128x64xf32>, vector<1x64xf32> -> vector<1x64xf32>
      %c0_34 = arith.constant 0 : index
      %c0_35 = arith.constant 0 : index
      %51 = vector.load %arg8[%c0_34, %c0_35] : memref<1x64xf32, #tpu.memory_space<vmem>>, vector<1x64xf32>
      %52 = arith.addf %50, %51 : vector<1x64xf32>
      %cst_36 = arith.constant 0.000000e+00 : f32
      %53 = vector.broadcast %cst_36 : f32 to vector<1x64xf32>
      %54 = arith.maximumf %52, %53 : vector<1x64xf32>
      %c0_37 = arith.constant 0 : index
      %c0_38 = arith.constant 0 : index
      %55 = vector.load %arg9[%c0_37, %c0_38] : memref<64x10xf32, #tpu.memory_space<vmem>>, vector<64x10xf32>
      %cst_39 = arith.constant dense<0.000000e+00> : vector<1x10xf32>
      %56 = tpu.matmul %54, %55, %cst_39 {dimension_numbers = #tpu.dot_dimension_numbers<[1], [0], [0], [1], [0, 0, 1, 1], [], []>} : vector<1x64xf32>, vector<64x10xf32>, vector<1x10xf32> -> vector<1x10xf32>
      %c0_40 = arith.constant 0 : index
      %c0_41 = arith.constant 0 : index
      %57 = vector.load %arg10[%c0_40, %c0_41] : memref<1x10xf32, #tpu.memory_space<vmem>>, vector<1x10xf32>
      %58 = arith.addf %56, %57 : vector<1x10xf32>
      %c0_42 = arith.constant 0 : index
      %c0_43 = arith.constant 0 : index
      %c0_44 = arith.constant 0 : index
      %59 = vector.load %arg12[%c0_42, %c0_43, %c0_44] : memref<1x1x10xf32, #tpu.memory_space<vmem>>, vector<1x1x10xf32>
      %60 = vector.shape_cast %59 : vector<1x1x10xf32> to vector<1x10xf32>
      %61 = vector.shape_cast %58 : vector<1x10xf32> to vector<1x1x10xf32>
      tpu.vector_store %arg12[%c0_42, %c0_43, %c0_44], %61 {strides = array<i32>} : memref<1x1x10xf32, #tpu.memory_space<vmem>>, vector<1x1x10xf32>,
    } else {
    }
    return
  }
  func.func @transform_0(%arg0: i32, %arg1: i32) -> (i32, i32, i32) {
    %c0_i32 = arith.constant 0 : i32
    %c0_i32_0 = arith.constant 0 : i32
    return %arg0, %c0_i32, %arg1 : i32, i32, i32
  }
  func.func @transform_1(%arg0: i32, %arg1: i32) -> (i32, i32) {
    %c0_i32 = arith.constant 0 : i32
    %c0_i32_0 = arith.constant 0 : i32
    %c0_i32_1 = arith.constant 0 : i32
    return %c0_i32, %c0_i32_0 : i32, i32
  }
  func.func @transform_2(%arg0: i32, %arg1: i32) -> (i32, i32) {
    %c0_i32 = arith.constant 0 : i32
    %c0_i32_0 = arith.constant 0 : i32
    %c0_i32_1 = arith.constant 0 : i32
    return %c0_i32, %c0_i32_0 : i32, i32
  }
  func.func @transform_3(%arg0: i32, %arg1: i32) -> (i32, i32) {
    %c0_i32 = arith.constant 0 : i32
    %c0_i32_0 = arith.constant 0 : i32
    %c0_i32_1 = arith.constant 0 : i32
    return %c0_i32, %c0_i32_0 : i32, i32
  }
  func.func @transform_4(%arg0: i32, %arg1: i32) -> (i32, i32) {
    %c0_i32 = arith.constant 0 : i32
    %c0_i32_0 = arith.constant 0 : i32
    %c0_i32_1 = arith.constant 0 : i32
    return %c0_i32, %c0_i32_0 : i32, i32
  }
  func.func @transform_5(%arg0: i32, %arg1: i32) -> (i32, i32) {
    %c0_i32 = arith.constant 0 : i32
    %c0_i32_0 = arith.constant 0 : i32
    %c0_i32_1 = arith.constant 0 : i32
    return %c0_i32, %c0_i32_0 : i32, i32
  }
  func.func @transform_6(%arg0: i32, %arg1: i32) -> (i32, i32) {
    %c0_i32 = arith.constant 0 : i32
    %c0_i32_0 = arith.constant 0 : i32
    %c0_i32_1 = arith.constant 0 : i32
    return %c0_i32, %c0_i32_0 : i32, i32
  }
  func.func @transform_7(%arg0: i32, %arg1: i32) -> (i32, i32) {
    %c0_i32 = arith.constant 0 : i32
    %c0_i32_0 = arith.constant 0 : i32
    %c0_i32_1 = arith.constant 0 : i32
    return %c0_i32, %c0_i32_0 : i32, i32
  }
  func.func @transform_8(%arg0: i32, %arg1: i32) -> (i32, i32) {
    %c0_i32 = arith.constant 0 : i32
    %c0_i32_0 = arith.constant 0 : i32
    %c0_i32_1 = arith.constant 0 : i32
    return %c0_i32, %c0_i32_0 : i32, i32
  }
  func.func @transform_9(%arg0: i32, %arg1: i32) -> (i32, i32, i32) {
    %c0_i32 = arith.constant 0 : i32
    %c0_i32_0 = arith.constant 0 : i32
    %c0_i32_1 = arith.constant 0 : i32
    return %arg0, %c0_i32, %c0_i32_0 : i32, i32, i32
  }
  func.func @transform_10(%arg0: i32, %arg1: i32) -> (i32, i32, i32) {
    %c0_i32 = arith.constant 0 : i32
    %c0_i32_0 = arith.constant 0 : i32
    %c0_i32_1 = arith.constant 0 : i32
    return %arg0, %c0_i32, %c0_i32_0 : i32, i32, i32
  }
}

</mosaic_0001>

<bundles_post_ra>
// kernel: tpu_custom_call.1
= control target key start
LH: loop header
LB: loop body
LE: loop exit
PB: predicated region body
PF: predicated region fallthrough
CT: control target
= control target key end

     0   :  { %16 = vsyncpa [#allocation4], 0  ;;  %s1718_s0 = inlined_call_operand.vmem [shape: bf16[2,4,256], index: 0, kind: input, shape index: {}]   ;;  %s1719_s1 = inlined_call_operand.vmem [shape: bf16[32,4], index: 1, kind: input, shape index: {}]   ;;  %s1720_s2 = inlined_call_operand.vmem [shape: f32[32,1], index: 2, kind: input, shape index: {}]   ;;  %s1721_s3 = inlined_call_operand.vmem [shape: f32[32,128], index: 3, kind: input, shape index: {}]   ;;  %s1722_s4 = inlined_call_operand.vmem [shape: f32[1,128], index: 4, kind: input, shape index: {}]   ;;  %s1723_s5 = inlined_call_operand.vmem [shape: f32[128,64], index: 5, kind: input, shape index: {}]   ;;  %s1724_s6 = inlined_call_operand.vmem [shape: f32[1,64], index: 6, kind: input, shape index: {}]   ;;  %s1725_s7 = inlined_call_operand.vmem [shape: f32[64,10], index: 7, kind: input, shape index: {}]   ;;  %s1726_s8 = inlined_call_operand.vmem [shape: f32[1,10], index: 8, kind: input, shape index: {}]   ;;  %s1727_s9 = inlined_call_operand.hbm [shape: f32[2,1,32], index: 9, kind: output, shape index: {0}]   ;;  %s1728_s10 = inlined_call_operand.hbm [shape: f32[2,1,10], index: 10, kind: output, shape index: {1}]  }
   0x1   :  { %18 = vsyncpa [#allocation4 + $0x1], 0 }
   0x2   :  { %19 = vsyncpa [#allocation6], 0 }
   0x3   :  { %21 = vsyncpa [#allocation6 + $0x1], 0  ;;  %s1418_s13 = smov 0   ;;  %s1420_s14 = smov 0  }
   0x4   :  { %s1422_s15 = smov 0   ;;  %s1424_s16 = smov 0  }
   0x5   :  { %s1426_s17 = smov 0   ;;  %s1428_s18 = smov 0  }
   0x6 LB: > { %1732 = sst [smem:[#allocation9_spill]] %s1351_s17  ;;  %s1017_s19 = sadd.s32 4294967295, %s1355_s18   ;;  %s1355_s18 = sphi %s1428_s18, %s27_s18   ;;  %s1351_s17 = sphi %s1426_s17, %s1738_s17   ;;  %s1347_s16 = sphi %s1424_s16, %s1737_s16   ;;  %s1343_s15 = sphi %s1422_s15, %s1741_s15   ;;  %s1339_s14 = sphi %s1420_s14, %s1740_s14   ;;  %s1335_s13 = sphi %s1418_s13, %s1739_s13  }
   0x7   : > { %s1018_s20 = sadd.s32 4294967294, %s1355_s18   ;;  %s39_s21 = sadd.s32 1, %s1351_s17 }
   0x8   : > { %s242_s22 = sadd.s32 1, %s1343_s15  ;;  %p41_p0 = scmp.ge.s32.totalorder %s39_s21, 2 }
   0x9   : > { %p252_p1 = scmp.ne.s32.totalorder %s1343_s15, %s1339_s14  ;;  %p253_p2 = scmp.eq.s32.totalorder %s1017_s19, 1 }
   0xa   : > { %p258_p3 = scmp.ne.s32.totalorder %s1339_s14, %s1335_s13  ;;  %s1743_s21 = smov (%p41_p0, %s39_s21), 0 }
   0xb   : > { %1733 = sst [smem:[#allocation10_spill]] %s1743_s21  ;;  %p1458_p4 = por %p253_p2, %p252_p1 }
   0xc   : > { %p259_p5 = scmp.eq.s32.totalorder %s1018_s20, 1  ;;  %s239_s24 = ssub.s32 %s1351_s17, %s1743_s21 }
   0xd   : > { %p1021_p6 = scmp.ge.s32.totalorder %s1355_s18, 1  ;;  %p240_p7 = scmp.eq.s32.totalorder %s239_s24, 0 }
   0xe   : > { %p1465_p8 = por %p259_p5, %p258_p3  ;;  %p340_p9 = scmp.lt.s32.totalorder %s1355_s18, 3 }
   0xf   : > { %s1471_s26 = scalar_select %p240_p7, %s1343_s15, %s242_s22  }
  0x10   : > { %p341_p10 = pnand %p1021_p6, %p340_p9 }
  0x11   : > { %p386_p11 = scmp.lt.s32.totalorder (!%p341_p10), %s1347_s16, 1  ;;  %v1357_v0 = vmov (!%p341_p10), 0   ;;  %v410_v1 = vld [vmem:[%s1720_s2] sm:$0xff] (!%p341_p10)  ;;  %v412_v2 = vld [vmem:[%s1720_s2 + $0x10] sm:$0xff] (!%p341_p10)  ;;  %vm460_vm0 = vcmask (!%p341_p10), 1041408   ;;  %v411_v3 = vld [vmem:[%s1720_s2 + $0x8] sm:$0xff] (!%p341_p10) }
  0x12   : > { %344 = sbr.rel (%p341_p10) target bundleno = 1265 (0x4f1), region = 56  ;;  %499 = vmatprep.mubr.bf16.mxu0 (!%p341_p10), %v1357_v0  ;;  %1239 = vset.pattern.permute.xlu0 (!%p341_p10), %v1357_v0  ;;  %v413_v4 = vld [vmem:[%s1720_s2 + $0x18] sm:$0xff] (!%p341_p10)  ;;  %v1241_v8 = vld [vmem:[%s1719_s1] sm:$0xff] (!%p341_p10)   ;;  %vm453_vm1 = vcmask (!%p341_p10), 31744   ;;  %v1242_v9 = vld [vmem:[%s1719_s1 + $0x8] sm:$0xff] (!%p341_p10)   ;;  %vm400_vm2 = vcmask (!%p341_p10), 7168  }
  0x13   : > { %1240 = vset.pattern.permute.xlu1 (!%p341_p10), %v1357_v0  ;;  %416 = vperm.xlu0 (!%p341_p10), %1239, %v410_v1   ;;  %v1358_v10 = vmov (!%p341_p10), 0.0   ;;  %vm1360_vm3 = vmmov (!%p341_p10), 0   ;;  %vm622_vm6 = vcmask (!%p341_p10), 261120   ;;  %s1586_s17 = sand.u32 (!%p341_p10), 1, %s1339_s14   ;;  %vm636_vm9 = vcmask (!%p341_p10), 253952   ;;  %s1731_s24 = sshll.u32 (!%p341_p10), %s1347_s16, 4 }
  0x14   : > { %426 = vperm.xlu1 (!%p341_p10), %1240, %v412_v2   ;;  %401 = vst.msk [vmem:[#allocation2] sm:$0xff] (!%p341_p10), %vm400_vm2, %v1358_v10  ;;  %402 = vst.msk [vmem:[#allocation2 + $0x8] sm:$0xff] (!%p341_p10), %vm400_vm2, %v1358_v10  ;;  %1076 = vmatprep.mubr.msk.f32.mxu1 (!%p341_p10), %vm1360_vm3, %v1358_v10  ;;  %vm814_vm10 = vcmask (!%p341_p10), 523264   ;;  %s1639_s29 = scalar_lea.hbm (!%p341_p10), %s1727_s9, %s1731_s24  ;;  %s891_s11 = scalar_lea.sflag (!%p341_p10), [#allocation4], %s1586_s17 }
  0x15   : > { %403 = vst.msk [vmem:[#allocation2 + $0x10] sm:$0xff] (!%p341_p10), %vm400_vm2, %v1358_v10  ;;  %404 = vst.msk [vmem:[#allocation2 + $0x18] sm:$0xff] (!%p341_p10), %vm400_vm2, %v1358_v10  ;;  %s1361_s19 = smov (!%p341_p10), [#allocation3]  }
  0x16   : > { %s1249_s20 = sshll.u32 (!%p341_p10), %s1361_s19, 4  ;;  %s1250_s20 = int_to_ptr.vmem [resolvable:$false] %s1249_s20 }
  0x17   : > { %421 = vperm.xlu0 (!%p341_p10), %1239, %v411_v3   ;;  %s1251_s22 = scalar_lea.vmem (!%p341_p10), %s1250_s20, 32 }
  0x18   : > { %431 = vperm.xlu1 (!%p341_p10), %1240, %v413_v4  }
  0x19   : > { %s387_s27 = scalar_select %p386_p11, %s1347_s16, 1 }
  0x1b   : > { %s1036_s12 = sshll.u32 %s387_s27, 2  ;;  %v528_v43 = vld [vmem:[#allocation2] sm:$0xff]  ;;  %v529_v45 = vld [vmem:[#allocation2 + $0x8] sm:$0xff] }
  0x1c   : > { %s393_s21 = scalar_lea.vmem %s1718_s0, %s1036_s12  ;;  %v530_v49 = vld [vmem:[#allocation2 + $0x10] sm:$0xff]  ;;  %v531_v52 = vld [vmem:[#allocation2 + $0x18] sm:$0xff] }
  0x1d   : > { %v1026_v5 = vld.sshfl [vmem:[%s393_s21] sm:$0x33 pattern:$0x76325410]  ;;  %s378_s21 = scalar_lea.vmem [#allocation3], %s1586_s17 }
  0x1e   : > { %v452_v6 = vcombine.high %v1026_v5, %v1026_v5  ;;  %v462_v7 = vsel %vm460_vm0, %v1026_v5, 0  ;;  %s907_s30 = sshll.u32 %s378_s21, 4  ;;  %s908_s30 = int_to_ptr.vmem [resolvable:$true] %s907_s30 }
  0x1f   : > { %s1245_s12 = scalar_lea.vmem %s908_s30, 16  ;;  %p1252_p1 = scmp.lt.s32.totalorder %s908_s30, %s1250_s20 }
  0x20   : > { %1027 = vmatprep.subr.msk.bf16.mxu0 %vm460_vm0, %v452_v6  ;;  %p1246_p12 = scmp.ne.s32.totalorder %s908_s30, %s1245_s12  ;;  %p1253_p2 = scmp.lt.s32.totalorder %s1251_s22, %s1245_s12 }
  0x21   : > { %468 = vmatpush1.bf16.msra.mxu0 %v462_v7 }
  0x22   : > { %p1247_p13 = pnand %p1246_p12, %p1458_p4  ;;  %p1254_p3 = por %p1253_p2, %p1252_p1 }
  0x24   : > { %1028 = vmatmul.mubr.msk.bf16.vlgmr.msra.gmra.mrb[0].mxu0 %vm453_vm1, %v1241_v8  ;;  %p1248_p0 = pneg %p1247_p13 }
  0x25   : > { %509 = vmatprep.mubr.bf16.mxu0 %v1357_v0 }
  0x26   : > { %p1255_p5 = pnand %p1254_p3, %p1248_p0 }
  0x2c   : > { %1029 = vmatmul.mubr.msk.bf16.gmra.mrb[4].mxu0 %vm453_vm1, %v1242_v9 }
  0x2d   : > { %1111 = vmatprep.mubr.msk.f32.mxu0 %vm1360_vm3, %v1358_v10 }
  0x92   : > { %v417_v11 = vpop.permute.xlu0 %416 }
  0x93   : > { %v427_v18 = vpop.permute.xlu1 %426 }
  0x96   : > { %v422_v13 = vpop.permute.xlu0 %421 }
  0x97   : > { %v432_v28 = vpop.permute.xlu1 %431 }
  0xf7   : > { %v501_v12 = vpop.f32.mrb[0].mxu0 }
  0xf8   : > { %v502_v14 = vadd.f32 %v501_v12, %v417_v11  ;;  %v503_v15 = vpop.f32.mrb[1].mxu0 }
  0xf9   : > { %v504_v16 = vadd.f32 %v503_v15, %v417_v11  ;;  %v505_v17 = vpop.f32.mrb[2].mxu0 }
  0xfa   : > { %v520_v19 = vmax.f32 %v502_v14, 0.0  ;;  %v506_v20 = vadd.f32 %v505_v17, %v422_v13  ;;  %v507_v21 = vpop.f32.mrb[3].mxu0 }
  0xfb   : > { %v521_v22 = vmax.f32 %v504_v16, 0.0  ;;  %v508_v23 = vadd.f32 %v507_v21, %v422_v13 }
  0xfc   : > { %v522_v24 = vmax.f32 %v506_v20, 0.0 }
  0xfd   : > { %v523_v25 = vmax.f32 %v508_v23, 0.0  ;;  %v532_v26 = vadd.f32 %v521_v22, %v520_v19  ;;  %v638_v23 = vld [vmem:[%s1721_s3] sm:$0xff] }
  0xff   : > { %v511_v27 = vpop.f32.mrb[4].mxu0  ;;  %533 = vadd.xlane.f32.xlu0 %v532_v26  ;;  %v535_v29 = vadd.f32 %v523_v25, %v522_v24  ;;  %v639_v24 = vld [vmem:[%s1721_s3 + $0x8] sm:$0xff]  ;;  %v1359_v26 = vmov 0.0|0.0  }
 0x100   : > { %v512_v30 = vadd.f32 %v511_v27, %v427_v18  ;;  %v513_v31 = vpop.f32.mrb[5].mxu0  ;;  %v1134_v25 = vpack.c.bf16 %v639_v24, %v638_v23  ;;  %1133 = vmatprep.subr.bf16.mxu1 %v1359_v26  ;;  %1139 = vmatprep.subr.bf16.mxu0 %v1359_v26  ;;  %v640_v27 = vld [vmem:[%s1721_s3 + $0x10] sm:$0xff]  ;;  %v809_v23 = vld [vmem:[%s1725_s7 + $0x20] sm:$0xff]  ;;  %v810_v24 = vld [vmem:[%s1725_s7 + $0x28] sm:$0xff] }
 0x101   : > { %v514_v32 = vadd.f32 %v513_v31, %v427_v18  ;;  %v515_v33 = vpop.f32.mrb[6].mxu0  ;;  %536 = vadd.xlane.f32.xlu1 %v535_v29  ;;  %v718_v31 = vld [vmem:[%s1723_s5 + $0x8] sm:$0xff] }
 0x102   : > { %v524_v34 = vmax.f32 %v512_v30, 0.0  ;;  %v516_v35 = vadd.f32 %v515_v33, %v432_v28  ;;  %v517_v36 = vpop.f32.mrb[7].mxu0  ;;  %1135 = vmatpush3.bf16.msra.mxu1 %v1134_v25  ;;  %v717_v30 = vld [vmem:[%s1723_s5] sm:$0xff]  ;;  %v1170_v25 = vpack.c.bf16 %v810_v24, %v809_v23 }
 0x103   : > { %v525_v37 = vmax.f32 %v514_v32, 0.0  ;;  %v518_v38 = vadd.f32 %v517_v36, %v432_v28  ;;  %1136 = vmatprep.subr.bf16.mxu1 %v1359_v26  ;;  %v641_v28 = vld [vmem:[%s1721_s3 + $0x18] sm:$0xff]  ;;  %v719_v32 = vld [vmem:[%s1723_s5 + $0x10] sm:$0xff]  ;;  %v1140_v33 = vpack.c.bf16 %v718_v31, %v717_v30  ;;  %v721_v36 = vld [vmem:[%s1723_s5 + $0x20] sm:$0xff] }
 0x104   : > { %v526_v39 = vmax.f32 %v516_v35, 0.0  ;;  %v1137_v29 = vpack.c.bf16 %v641_v28, %v640_v27  ;;  %v642_v27 = vld [vmem:[%s1722_s4] sm:$0x1] }
 0x105   : > { %v527_v40 = vmax.f32 %v518_v38, 0.0  ;;  %v538_v41 = vadd.f32 %v525_v37, %v524_v34  ;;  %v720_v34 = vld [vmem:[%s1723_s5 + $0x18] sm:$0xff]  ;;  %1141 = vmatpush3.bf16.msra.mxu0 %v1140_v33  ;;  %v722_v37 = vld [vmem:[%s1723_s5 + $0x28] sm:$0xff] }
 0x106   : > { %1138 = vmatpush3.bf16.msra.mxu1 %v1137_v29  ;;  %v1143_v35 = vpack.c.bf16 %v720_v34, %v719_v32  ;;  %1142 = vmatprep.subr.bf16.mxu0 %v1359_v26  ;;  %v1146_v38 = vpack.c.bf16 %v722_v37, %v721_v36  ;;  %v811_v32 = vld [vmem:[%s1725_s7 + $0x30] sm:$0xff]  ;;  %v733_v34 = vld [vmem:[%s1724_s6] sm:$0x1] }
 0x107   : > { %539 = vadd.xlane.f32.xlu0 %v538_v41  ;;  %v541_v42 = vadd.f32 %v527_v40, %v526_v39  ;;  %1163 = vmatprep.subr.bf16.mxu1 %v1359_v26  ;;  %v723_v39 = vld [vmem:[%s1723_s5 + $0x30] sm:$0xff]  ;;  %v724_v40 = vld [vmem:[%s1723_s5 + $0x38] sm:$0xff] }
 0x108   : > { %v1149_v41 = vpack.c.bf16 %v724_v40, %v723_v39 }
 0x109   : > { %1144 = vmatpush3.bf16.msra.mxu0 %v1143_v35 }
 0x10a   : > { %1145 = vmatprep.subr.bf16.mxu0 %v1359_v26 }
 0x10b   : > { %542 = vadd.xlane.f32.xlu0 %v541_v42  ;;  %v725_v42 = vld [vmem:[%s1723_s5 + $0x40] sm:$0xff] }
 0x10d   : > { %1147 = vmatpush3.bf16.msra.mxu0 %v1146_v38 }
 0x10e   : > { %1148 = vmatprep.subr.bf16.mxu0 %v1359_v26 }
 0x111   : > { %1150 = vmatpush3.bf16.msra.mxu0 %v1149_v41 }
 0x112   : > { %1151 = vmatprep.subr.bf16.mxu0 %v1359_v26 }
 0x18c   : > { %v534_v44 = vpop.xlane.xlu0 %533 }
 0x18d   : > { %v544_v46 = vadd.f32 %v534_v44, %v528_v43  ;;  %v726_v43 = vld [vmem:[%s1723_s5 + $0x48] sm:$0xff] }
 0x18e   : > { %v537_v47 = vpop.xlane.xlu1 %536  ;;  %v1152_v44 = vpack.c.bf16 %v726_v43, %v725_v42 }
 0x18f   : > { %549 = vst.msk [vmem:[#allocation2] sm:$0xff] %vm400_vm2, %v544_v46  ;;  %v545_v48 = vadd.f32 %v537_v47, %v529_v45  ;;  %v727_v45 = vld [vmem:[%s1723_s5 + $0x50] sm:$0xff]  ;;  %v728_v46 = vld [vmem:[%s1723_s5 + $0x58] sm:$0xff] }
 0x190   : > { %1153 = vmatpush3.bf16.msra.mxu0 %v1152_v44  ;;  %v1155_v47 = vpack.c.bf16 %v728_v46, %v727_v45 }
 0x191   : > { %550 = vst.msk [vmem:[#allocation2 + $0x8] sm:$0xff] %vm400_vm2, %v545_v48  ;;  %1154 = vmatprep.subr.bf16.mxu0 %v1359_v26  ;;  %v729_v48 = vld [vmem:[%s1723_s5 + $0x60] sm:$0xff] }
 0x194   : > { %v540_v50 = vpop.xlane.xlu0 %539  ;;  %1156 = vmatpush3.bf16.msra.mxu0 %v1155_v47 }
 0x195   : > { %v546_v51 = vadd.f32 %v540_v50, %v530_v49  ;;  %v730_v49 = vld [vmem:[%s1723_s5 + $0x68] sm:$0xff]  ;;  %1157 = vmatprep.subr.bf16.mxu0 %v1359_v26 }
 0x196   : > { %v556_v54 = vld [vmem:[#allocation2] sm:$0xff]  ;;  %v1158_v50 = vpack.c.bf16 %v730_v49, %v729_v48 }
 0x197   : > { %551 = vst.msk [vmem:[#allocation2 + $0x10] sm:$0xff] %vm400_vm2, %v546_v51  ;;  %v560_v58 = vmul.f32 0.00390625, %v556_v54  ;;  %v587_v51 = vlaneseq }
 0x198   : > { %v543_v53 = vpop.xlane.xlu0 %542  ;;  %v557_v55 = vld [vmem:[#allocation2 + $0x8] sm:$0xff]  ;;  %1159 = vmatpush3.bf16.msra.mxu0 %v1158_v50 }
 0x199   : > { %v547_v56 = vadd.f32 %v543_v53, %v531_v52  ;;  %v561_v57 = vmul.f32 0.00390625, %v557_v55  ;;  %v564_v62 = vmul.f32 %v560_v58, %v560_v58  ;;  %1160 = vmatprep.subr.bf16.mxu0 %v1359_v26  ;;  %v588_v52 = vshrl.u32 %v587_v51, 7 }
 0x19a   : > { %v593_v54 = vand.u32 127, %v587_v51 }
 0x19b   : > { %552 = vst.msk [vmem:[#allocation2 + $0x18] sm:$0xff] %vm400_vm2, %v547_v56  ;;  %v565_v59 = vmul.f32 %v561_v57, %v561_v57  ;;  %v568_v3 = vsel %vm400_vm2, %v564_v62, 0.0  ;;  %v589_v53 = vadd.s32 8, %v588_v52  ;;  %v590_v55 = vadd.s32 16, %v588_v52 }
 0x19c   : > { %vm594_vm5 = vcmp.eq.s32.totalorder %v588_v52, %v593_v54 }
 0x19d   : > { %v569_v0 = vsel %vm400_vm2, %v565_v59, 0.0  ;;  %vm595_vm4 = vcmp.eq.s32.totalorder %v589_v53, %v593_v54  ;;  %vm596_vm7 = vcmp.eq.s32.totalorder %v590_v55, %v593_v54 }
 0x19e   : > { %v558_v60 = vld [vmem:[#allocation2 + $0x10] sm:$0xff]  ;;  %v570_v5 = vadd.f32 %v569_v0, %v568_v3 }
 0x19f   : > { %v562_v61 = vmul.f32 0.00390625, %v558_v60  ;;  %v591_v60 = vadd.s32 24, %v588_v52 }
 0x1a1   : > { %v566_v63 = vmul.f32 %v562_v61, %v562_v61  ;;  %vm597_vm8 = vcmp.eq.s32.totalorder %v591_v60, %v593_v54 }
 0x1a2   : > { %v559_v1 = vld [vmem:[#allocation2 + $0x18] sm:$0xff] }
 0x1a3   : > { %v563_v2 = vmul.f32 0.00390625, %v559_v1  ;;  %v571_v4 = vsel %vm400_vm2, %v566_v63, 0.0 }
 0x1a4   : > { %v572_v7 = vadd.f32 %v571_v4, %v570_v5 }
 0x1a5   : > { %v567_v6 = vmul.f32 %v563_v2, %v563_v2 }
 0x1a7   : > { %v573_v8 = vsel %vm400_vm2, %v567_v6, 0.0 }
 0x1a8   : > { %v574_v9 = vadd.f32 %v573_v8, %v572_v7 }
 0x1aa   : > { %v575_v11 = vrot.slane %v574_v9, 4 }
 0x1ac   : > { %v576_v12 = vadd.f32 %v575_v11, %v574_v9 }
 0x1ae   : > { %v577_v13 = vrot.slane %v576_v12, 2 }
 0x1b0   : > { %v578_v14 = vadd.f32 %v577_v13, %v576_v12 }
 0x1b2   : > { %v579_v15 = vrot.slane %v578_v14, 1 }
 0x1b4   : > { %v580_v16 = vadd.f32 %v579_v15, %v578_v14  ;;  %v731_v15 = vld [vmem:[%s1723_s5 + $0x70] sm:$0xff] }
 0x1b6   : > { %v581_v17 = vmax.f32 %v580_v16, 1e-24  ;;  %v732_v16 = vld [vmem:[%s1723_s5 + $0x78] sm:$0xff] }
 0x1b8   : > { %1243 = vrsqrt.f32 %v581_v17  ;;  %v1161_v17 = vpack.c.bf16 %v732_v16, %v731_v15 }
 0x1ba   : > { %1162 = vmatpush3.bf16.msra.mxu0 %v1161_v17 }
 0x1c2   : > { %v1244_v18 = vpop.eup %1243 }
 0x1c3   : > { %v584_v19 = vmul.f32 %v1244_v18, %v561_v57  ;;  %v583_v20 = vmul.f32 %v1244_v18, %v560_v58  ;;  %v585_v21 = vmul.f32 %v1244_v18, %v562_v61  ;;  %v586_v22 = vmul.f32 %v1244_v18, %v563_v2  ;;  %v805_v18 = vld [vmem:[%s1725_s7] sm:$0xff] }
 0x1c5   : > { %605 = vperm.xlu0 %1239, %v584_v19   ;;  %600 = vperm.xlu1 %1240, %v583_v20   ;;  %v806_v19 = vld [vmem:[%s1725_s7 + $0x8] sm:$0xff] }
 0x1c6   : > { %v1164_v20 = vpack.c.bf16 %v806_v19, %v805_v18 }
 0x1c9   : > { %610 = vperm.xlu1 %1240, %v585_v21   ;;  %v808_v21 = vld [vmem:[%s1725_s7 + $0x18] sm:$0xff] }
 0x1cd   : > { %615 = vperm.xlu1 %1240, %v586_v22  }
 0x244   : > { %v606_v56 = vpop.permute.xlu0 %605  ;;  %v601_v57 = vpop.permute.xlu1 %600 }
 0x245   : > { %v619_v58 = vsel %vm595_vm4, %v606_v56, 0.0  ;;  %v618_v59 = vsel %vm594_vm5, %v601_v57, 0.0 }
 0x246   : > { %v624_v61 = vsel %vm622_vm6, %v619_v58, 0.0  ;;  %v623_v62 = vsel %vm622_vm6, %v618_v59, 0.0 }
 0x247   : > { %v625_v2 = vadd.f32 %v624_v61, %v623_v62 }
 0x248   : > { %v611_v63 = vpop.permute.xlu1 %610 }
 0x249   : > { %v620_v0 = vsel %vm596_vm7, %v611_v63, 0.0 }
 0x24a   : > { %v626_v1 = vsel %vm622_vm6, %v620_v0, 0.0 }
 0x24b   : > { %v627_v4 = vadd.f32 %v626_v1, %v625_v2 }
 0x24c   : > { %v616_v3 = vpop.permute.xlu1 %615 }
 0x24d   : > { %v621_v5 = vsel %vm597_vm8, %v616_v3, 0.0 }
 0x24e   : > { %v628_v6 = vsel %vm622_vm6, %v621_v5, 0.0 }
 0x24f   : > { %v629_v7 = vadd.f32 %v628_v6, %v627_v4 }
 0x251   : > { %v630_v8 = vrot.slane %v629_v7, 4 }
 0x253   : > { %v631_v9 = vadd.f32 %v630_v8, %v629_v7 }
 0x255   : > { %v632_v11 = vrot.slane %v631_v9, 2 }
 0x257   : > { %v633_v12 = vadd.f32 %v632_v11, %v631_v9 }
 0x259   : > { %v634_v13 = vrot.slane %v633_v12, 1 }
 0x25b   : > { %v635_v14 = vadd.f32 %v634_v13, %v633_v12 }
 0x25d   : > { %1077 = vmatmul.mubr.msk.f32.vlgmr.msra.gmra.mrb[0].mxu1 %vm622_vm6, %v635_v14  ;;  %637 = vst.msk [vmem:[%s378_s21] sm:$0x1] %vm636_vm9, %v635_v14 }
 0x25e   : > { %1130 = vmatprep.mubr.msk.f32.mxu1 %vm1360_vm3, %v1358_v10  ;;  %v807_v10 = vld [vmem:[%s1725_s7 + $0x10] sm:$0xff]  ;;  %1165 = vmatpush3.bf16.msra.mxu1 %v1164_v20 }
 0x25f   : > { %v1167_v22 = vpack.c.bf16 %v808_v21, %v807_v10  ;;  %1166 = vmatprep.subr.bf16.mxu1 %v1359_v26 }
 0x262   : > { %1168 = vmatpush3.bf16.msra.mxu1 %v1167_v22 }
 0x263   : > { %1169 = vmatprep.subr.bf16.mxu1 %v1359_v26 }
 0x266   : > { %1171 = vmatpush3.bf16.msra.mxu1 %v1170_v25 }
 0x267   : > { %1172 = vmatprep.subr.bf16.mxu1 %v1359_v26  ;;  %v812_v26 = vld [vmem:[%s1725_s7 + $0x38] sm:$0xff] }
 0x268   : > { %v1173_v33 = vpack.c.bf16 %v812_v26, %v811_v32 }
 0x26a   : > { %1174 = vmatpush3.bf16.msra.mxu1 %v1173_v33 }
 0x330   : > { %v712_v28 = vpop.f32.mrb[0].mxu1 }
 0x331   : > { %v713_v29 = vadd.f32 %v712_v28, %v642_v27  ;;  %v1078_v30 = vpop.f32.mrb[1].mxu1 }
 0x333   : > { %v716_v31 = vmax.f32 %v713_v29, 0.0 }
 0x335   : > { %1112 = vmatmul.mubr.f32.vlgmr.msra.gmra.mrb[8].mxu0 %v716_v31 }
 0x408   : > { %v800_v35 = vpop.f32.mrb[8].mxu0 }
 0x409   : > { %v801_v36 = vadd.f32 %v800_v35, %v733_v34  ;;  %v1113_v37 = vpop.f32.mrb[9].mxu0 }
 0x40b   : > { %v804_v38 = vmax.f32 %v801_v36, 0.0 }
 0x40d   : > { %1131 = vmatmul.mubr.msk.f32.vlgmr.msra.gmra.mrb[2].mxu1 %vm814_vm10, %v804_v38 }
 0x40e   : > { %1258 = shalt.err (!%p1255_p5)
}
 0x40f   : > { %s1259_s21 = scalar_lea.hbm %s1639_s29, 16  ;;  %s1263_s19 = scalar_lea.hbm %s1727_s9, 32 }
 0x410   : > { %p1260_p6 = scmp.ne.s32.totalorder %s1639_s29, %s1259_s21  ;;  %p1264_p10 = scmp.lt.u32.totalorder %s1639_s29, %s1727_s9 }
 0x411   : > { %p1265_p11 = scmp.lt.u32.totalorder %s1263_s19, %s1259_s21  ;;  %p1267_p13 = scmp.lt.u32.totalorder %s1259_s21, %s1639_s29 }
 0x412   : > { %p1261_p7 = pnand %p1260_p6, %p1458_p4 }
 0x413   : > { %p1266_p12 = por %p1265_p11, %p1264_p10 }
 0x414   : > { %p1262_p9 = pneg %p1261_p7 }
 0x415   : > { %p1268_p0 = por %p1267_p13, %p1266_p12 }
 0x417   : > { %p1269_p1 = pnand %p1268_p0, %p1262_p9 }
 0x419   : > { %1272 = shalt.err (!%p1269_p1)
}
 0x41a   : > { %1175 = dma.vmem_to_hbm [thread:$0]  (%p1458_p4), %s908_s30, 16, %s1639_s29, %s891_s11   ;;  %v813_v39 = vld [vmem:[%s1726_s8] sm:$0x1]  ;;  %vm888_vm11 = vcmask 73728  }
 0x41b   : > { %s384_s24 = scalar_lea.vmem [#allocation5], %s1586_s17  ;;  %s1736_s21 = sshll.u32 %s1347_s16, 4 }
 0x41c   : > { %s920_s28 = sshll.u32 %s384_s24, 4  ;;  %s1670_s20 = scalar_lea.hbm %s1728_s10, %s1736_s21  ;;  %s1672_s28 = int_to_ptr.vmem [resolvable:$true] %s920_s28 }
 0x41d   : > { %s895_s29 = scalar_lea.sflag [#allocation6], %s1586_s17  ;;  %s1273_s30 = scalar_lea.vmem %s1672_s28, 16 }
 0x41e   : > { %p1274_p2 = scmp.ne.s32.totalorder %s1672_s28, %s1273_s30  ;;  %s1362_s11 = smov [#allocation5]  }
 0x41f   : > { %s1277_s12 = sshll.u32 %s1362_s11, 4  ;;  %s1278_s12 = int_to_ptr.vmem [resolvable:$false] %s1277_s12 }
 0x420   : > { %p1275_p3 = pnand %p1274_p2, %p1458_p4  ;;  %s1279_s16 = scalar_lea.vmem %s1278_s12, 32 }
 0x421   : > { %p1280_p6 = scmp.lt.s32.totalorder %s1672_s28, %s1278_s12  ;;  %p1281_p7 = scmp.lt.s32.totalorder %s1279_s16, %s1273_s30 }
 0x422   : > { %p1276_p5 = pneg %p1275_p3 }
 0x423   : > { %p1282_p9 = por %p1281_p7, %p1280_p6 }
 0x425   : > { %p1283_p10 = pnand %p1282_p9, %p1276_p5 }
 0x4e0   : > { %v884_v40 = vpop.f32.mrb[2].mxu1 }
 0x4e1   : > { %v885_v41 = vadd.f32 %v884_v40, %v813_v39  ;;  %v1132_v42 = vpop.f32.mrb[3].mxu1 }
 0x4e3   : > { %889 = vst.msk [vmem:[%s384_s24] sm:$0x1] %vm888_vm11, %v885_v41 }
 0x4e4   : > { %1286 = shalt.err (!%p1283_p10)
}
 0x4e5   : > { %s1287_s17 = scalar_lea.hbm %s1670_s20, 16  ;;  %s1291_s21 = scalar_lea.hbm %s1728_s10, 32 }
 0x4e6   : > { %p1288_p11 = scmp.ne.s32.totalorder %s1670_s20, %s1287_s17  ;;  %p1292_p0 = scmp.lt.u32.totalorder %s1670_s20, %s1728_s10 }
 0x4e7   : > { %p1293_p1 = scmp.lt.u32.totalorder %s1291_s21, %s1287_s17  ;;  %p1295_p3 = scmp.lt.u32.totalorder %s1287_s17, %s1670_s20 }
 0x4e8   : > { %p1289_p12 = pnand %p1288_p11, %p1458_p4 }
 0x4e9   : > { %p1294_p2 = por %p1293_p1, %p1292_p0 }
 0x4ea   : > { %p1290_p13 = pneg %p1289_p12 }
 0x4eb   : > { %p1296_p5 = por %p1295_p3, %p1294_p2 }
 0x4ed   : > { %p1297_p6 = pnand %p1296_p5, %p1290_p13 }
 0x4ef   : > { %1300 = shalt.err (!%p1297_p6)
}
 0x4f0   : > { %1176 = dma.vmem_to_hbm [thread:$0]  (%p1458_p4), %s1672_s28, 16, %s1670_s20, %s895_s29  }
 0x4f1 PF: > { %p1186_p7 = scmp.ge.s32.totalorder %s1355_s18, 2  ;;  %s932_s30 = sand.u32 1, %s1335_s13  }
 0x4f2   : > { %s933_s11 = scalar_lea.sflag [#allocation4], %s932_s30 }
 0x4f3   : > { %p1180_p9 = pnand %p1186_p7, %p1465_p8 }
 0x4f5   : > { %1326 = dma.done.wait (!%p1180_p9), %s933_s11, 16  }
 0x4f6   : > { %1328 = vsyncadd (!%p1180_p9), %s933_s11, 4294967280  ;;  %s941_s12 = scalar_lea.sflag [#allocation6], %s932_s30 }
 0x4f7   : > { %1330 = dma.done.wait (!%p1180_p9), %s941_s12, 16  }
 0x4f8   : > { %1332 = vsyncadd (!%p1180_p9), %s941_s12, 4294967280  ;;  %s27_s18 = sadd.s32 1, %s1355_s18   ;;  %s1737_s16 = sld [smem:[#allocation9_spill]] }
 0x4f9   : > { %p24_p10 = scmp.ge.s32.totalorder %s27_s18, 4   ;;  %s1738_s17 = sld [smem:[#allocation10_spill]] }
 0x4fa   : > { %s1739_s13 = smov %s1339_s14  ;;  %s1740_s14 = smov %s1343_s15 }
 0x4fb   : > { %s1741_s15 = smov %s1471_s26  ;;  %26 = sbr.rel (!%p24_p10) target bundleno = 6 (0x6), region = 116 }
 0x502   :  { %945 = vsyncpa [#allocation4], 1 }
 0x503   :  { %947 = vsyncpa [#allocation4 + $0x1], 1 }
 0x504   :  { %948 = vsyncpa [#allocation6], 1 }
 0x505   :  { %950 = vsyncpa [#allocation6 + $0x1], 1 }

</bundles_post_ra>
